<compile_context>
chip_gen: v6e
topology: v6e:2x2x1
jax: 0.10.0
libtpu: 0.0.40
codegen_flags: <defaults>
</compile_context>

<pallas_src>
import jax
import jax.numpy as jnp
from jax.experimental import pallas as pl
from jax.experimental.pallas import tpu as pltpu

_LANE = 128
_SUBLANE = 8
_NEG_BIG = -1e30  # large-but-finite: pad columns never win the max, exp -> 0


def _round_up(x, m):
    return (x + m - 1) // m * m


def _metaphor_kernel(x_ref, w_ref, b_ref, o_ref):
    # x_ref: (TM, K)  w_ref: (K, Np)  b_ref: (1, Np)  o_ref: (TM, N)  (N <= Np)
    # Dropout is inference-mode identity.
    # TODO(synk): training-mode dropout mask (pltpu.prng_random_bits) not implemented.

    # Linear layer on the MXU with f32 accumulation (x may be bf16 or f32).
    logits = jnp.dot(x_ref[...], w_ref[...],
                     preferred_element_type=jnp.float32) + b_ref[...]

    # Numerically-stable log_softmax over the padded lane axis. Pad columns
    # carry bias = -1e30, so exp(shifted) underflows to exactly 0 for them and
    # neither the row max nor the sum over real classes is perturbed.
    m = jnp.max(logits, axis=-1, keepdims=True)
    shifted = logits - m
    lse = jnp.log(jnp.sum(jnp.exp(shifted), axis=-1, keepdims=True))

    # Store only the real classes (static slice of the in-register result).
    n_real = o_ref.shape[-1]
    o_ref[...] = (shifted - lse)[:, :n_real].astype(o_ref.dtype)


def prepare_params(weight_t, bias):
    """Pad weight/bias to a full 128-lane class axis ONCE (hoisted out of the
    per-call forward path).

    weight_t: (2*hidden_dim, num_classes) — transposed nn.Linear weight.
    bias:     (num_classes,)
    """
    K, N = weight_t.shape
    n_pad = _round_up(max(N, 1), _LANE)
    w_pad = jnp.pad(weight_t.astype(jnp.float32), ((0, 0), (0, n_pad - N)))
    b_pad = jnp.pad(bias.astype(jnp.float32), (0, n_pad - N),
                    constant_values=_NEG_BIG).reshape(1, n_pad)
    return w_pad, b_pad, N


def metaphor_forward(out_embedding, lengths, w_pad, b_pad, num_classes,
                     *, block_m=4096):
    """out_embedding: (B, S, 2*hidden_dim)  — native dtype (f32 or bf16)
       lengths:       (B,) int32 (unused, matches the PyTorch signature)
       w_pad, b_pad:  padded params from prepare_params()
       returns:       (B, S, num_classes) float32 log-probabilities
    """
    del lengths  # unused in the reference forward
    B, S, K = out_embedding.shape
    Np = w_pad.shape[1]
    N = num_classes
    M = B * S

    x2d = out_embedding.reshape(M, K)  # keep native dtype (halves HBM read for bf16)

    # Row-tile size: the largest tile (capped at block_m, multiple of 8) that
    # still gives grid_m >= 2 so dimension_semantics=("parallel",) can shard
    # row tiles across v7x's two TensorCores. VMEM at tm=4096, K=64 is ~2 MiB
    # double-buffered — far under the scoped-VMEM default on all generations.
    tm = max(_SUBLANE, min(block_m, _round_up(pl.cdiv(M, 2), _SUBLANE)))
    grid_m = pl.cdiv(M, tm)

    cost = pl.CostEstimate(
        flops=2 * M * K * N,
        transcendentals=M * Np,
        bytes_accessed=(M * K * x2d.dtype.itemsize   # x read
                        + K * Np * 4 + Np * 4        # resident weight + bias
                        + M * N * 4),                # output write
    )

    out2d = pl.pallas_call(
        _metaphor_kernel,
        out_shape=jax.ShapeDtypeStruct((M, N), jnp.float32),
        grid_spec=pltpu.PrefetchScalarGridSpec(
            num_scalar_prefetch=0,
            grid=(grid_m,),
            in_specs=[
                pl.BlockSpec((tm, K), lambda i: (i, 0)),   # streamed row tiles
                pl.BlockSpec((K, Np), lambda i: (0, 0)),   # weight stays resident
                pl.BlockSpec((1, Np), lambda i: (0, 0)),   # bias stays resident
            ],
            out_specs=pl.BlockSpec((tm, N), lambda i: (i, 0)),
        ),
        compiler_params=pltpu.CompilerParams(
            dimension_semantics=("parallel",)),
        cost_estimate=cost,
    )(x2d, w_pad, b_pad)

    return out2d.reshape(B, S, N)


def _reference(out_embedding, weight_t, bias):
    logits = jnp.einsum("bsk,kn->bsn",
                        out_embedding.astype(jnp.float32),
                        weight_t.astype(jnp.float32)) + bias
    return jax.nn.log_softmax(logits, axis=-1)


if __name__ == "__main__":
    # Small shapes consistent with the module.
    batch, seq, hidden_dim, num_classes = 2, 8, 32, 4
    in_features = hidden_dim * 2  # nn.Linear(hidden_dim * 2, num_classes)

    key = jax.random.PRNGKey(0)
    k_x, k_w, k_b = jax.random.split(key, 3)

    out_embedding = jax.random.normal(k_x, (batch, seq, in_features),
                                      dtype=jnp.float32)
    lengths = jnp.full((batch,), seq, dtype=jnp.int32)

    # Deterministic parameter init (mimics nn.Linear uniform init scale).
    bound = 1.0 / jnp.sqrt(jnp.float32(in_features))
    weight_t = jax.random.uniform(k_w, (in_features, num_classes),
                                  minval=-bound, maxval=bound,
                                  dtype=jnp.float32)
    bias = jax.random.uniform(k_b, (num_classes,),
                              minval=-bound, maxval=bound,
                              dtype=jnp.float32)

    # Pad params once (hoisted out of the per-call path).
    w_pad, b_pad, n_cls = prepare_params(weight_t, bias)

    out = metaphor_forward(out_embedding, lengths, w_pad, b_pad, n_cls)
    out = jax.block_until_ready(out)

    ref = _reference(out_embedding, weight_t, bias)
    assert out.shape == (batch, seq, num_classes)
    assert jnp.all(jnp.isfinite(out)), "non-finite values in kernel output"
    assert jnp.allclose(out, ref, atol=1e-5, rtol=1e-5), "mismatch vs reference"

    print("KERNEL_OK")
</pallas_src>

<mosaic_0001>
module attributes {stable_mosaic.version = 11 : i64} {
  func.func @_metaphor_kernel(%arg0: i32, %arg1: memref<8x64xf32, #tpu.memory_space<vmem>>, %arg2: memref<64x128xf32, #tpu.memory_space<vmem>>, %arg3: memref<1x128xf32, #tpu.memory_space<vmem>>, %arg4: memref<8x4xf32, #tpu.memory_space<vmem>>) attributes {dimension_semantics = [#tpu.dimension_semantics<parallel>], iteration_bounds = array<i64: 2>, scalar_prefetch = 0 : i64, scratch_operands = 0 : i64, tpu.core_type = #tpu.core_type<tc>, window_params = [{transform_indices = @transform_0, window_bounds = array<i64: 8, 64>}, {pipeline_mode = #tpu.pipeline_mode<synchronous>, transform_indices = @transform_1, window_bounds = array<i64: 64, 128>}, {pipeline_mode = #tpu.pipeline_mode<synchronous>, transform_indices = @transform_2, window_bounds = array<i64: 1, 128>}, {transform_indices = @transform_3, window_bounds = array<i64: 8, 4>}]} {
    %c0 = arith.constant 0 : index
    %c0_0 = arith.constant 0 : index
    %0 = vector.load %arg1[%c0, %c0_0] : memref<8x64xf32, #tpu.memory_space<vmem>>, vector<8x64xf32>
    %c0_1 = arith.constant 0 : index
    %c0_2 = arith.constant 0 : index
    %1 = vector.load %arg2[%c0_1, %c0_2] : memref<64x128xf32, #tpu.memory_space<vmem>>, vector<64x128xf32>
    %cst = arith.constant dense<0.000000e+00> : vector<8x128xf32>
    %2 = tpu.matmul %0, %1, %cst {dimension_numbers = #tpu.dot_dimension_numbers<[1], [0], [0], [1], [0, 0, 1, 1], [], []>} : vector<8x64xf32>, vector<64x128xf32>, vector<8x128xf32> -> vector<8x128xf32>
    %c0_3 = arith.constant 0 : index
    %c0_4 = arith.constant 0 : index
    %3 = vector.load %arg3[%c0_3, %c0_4] : memref<1x128xf32, #tpu.memory_space<vmem>>, vector<1x128xf32>
    %4 = vector.broadcast %3 : vector<1x128xf32> to vector<8x128xf32>
    %5 = arith.addf %2, %4 : vector<8x128xf32>
    %cst_5 = arith.constant dense<0xFF800000> : vector<8xf32>
    %6 = vector.multi_reduction <maximumf>, %5, %cst_5 [1] : vector<8x128xf32> to vector<8xf32>
    %7 = vector.shape_cast %6 : vector<8xf32> to vector<8x1xf32>
    %8 = vector.broadcast %7 : vector<8x1xf32> to vector<8x128xf32>
    %9 = arith.subf %5, %8 : vector<8x128xf32>
    %10 = math.exp %9 : vector<8x128xf32>
    %cst_6 = arith.constant dense<0.000000e+00> : vector<8xf32>
    %11 = vector.multi_reduction <add>, %10, %cst_6 [1] : vector<8x128xf32> to vector<8xf32>
    %12 = vector.shape_cast %11 : vector<8xf32> to vector<8x1xf32>
    %13 = math.log %12 : vector<8x1xf32>
    %14 = vector.broadcast %13 : vector<8x1xf32> to vector<8x128xf32>
    %15 = arith.subf %9, %14 : vector<8x128xf32>
    %16 = vector.extract_strided_slice %15 {offsets = [0, 0], sizes = [8, 4], strides = [1, 1]} : vector<8x128xf32> to vector<8x4xf32>
    %c0_7 = arith.constant 0 : index
    %c0_8 = arith.constant 0 : index
    %17 = vector.load %arg4[%c0_7, %c0_8] : memref<8x4xf32, #tpu.memory_space<vmem>>, vector<8x4xf32>
    tpu.vector_store %arg4[%c0_7, %c0_8], %16 {strides = array<i32>} : memref<8x4xf32, #tpu.memory_space<vmem>>, vector<8x4xf32>,
    return
  }
  func.func @transform_0(%arg0: i32) -> (i32, i32) {
    %c0_i32 = arith.constant 0 : i32
    %c0_i32_0 = arith.constant 0 : i32
    return %arg0, %c0_i32 : i32, i32
  }
  func.func @transform_1(%arg0: i32) -> (i32, i32) {
    %c0_i32 = arith.constant 0 : i32
    %c0_i32_0 = arith.constant 0 : i32
    %c0_i32_1 = arith.constant 0 : i32
    return %c0_i32, %c0_i32_0 : i32, i32
  }
  func.func @transform_2(%arg0: i32) -> (i32, i32) {
    %c0_i32 = arith.constant 0 : i32
    %c0_i32_0 = arith.constant 0 : i32
    %c0_i32_1 = arith.constant 0 : i32
    return %c0_i32, %c0_i32_0 : i32, i32
  }
  func.func @transform_3(%arg0: i32) -> (i32, i32) {
    %c0_i32 = arith.constant 0 : i32
    %c0_i32_0 = arith.constant 0 : i32
    return %arg0, %c0_i32 : i32, i32
  }
}

</mosaic_0001>

<bundles_post_ra>
// kernel: tpu_custom_call.1
= control target key start
LH: loop header
LB: loop body
LE: loop exit
PB: predicated region body
PF: predicated region fallthrough
CT: control target
= control target key end

     0   :  { %8 = vsyncpa [#allocation3], 0  ;;  %s721_s0 = inlined_call_operand.hbm [shape: f32[16,64], index: 0, kind: input, shape index: {}]   ;;  %s722_s1 = inlined_call_operand.hbm [shape: f32[64,128], index: 1, kind: input, shape index: {}]   ;;  %s723_s2 = inlined_call_operand.vmem [shape: f32[1,128], index: 2, kind: input, shape index: {}]   ;;  %s724_s3 = inlined_call_operand.vmem [shape: f32[16,4], index: 3, kind: output, shape index: {}]  }
   0x1   :  { %10 = vsyncpa [#allocation3 + $0x1], 0 }
   0x2   :  { %11 = vsyncpa [#allocation5], 0  ;;  %s598_s12 = smov 0   ;;  %s600_s13 = smov 0  }
   0x3   :  { %s602_s14 = smov 0   ;;  %s604_s15 = smov 0  }
   0x4 LB: > { %s617_s16 = sadd.s32 4294967295, %s570_s15   ;;  %p37_p0 = scmp.ne.s32.totalorder %s562_s13, %s558_s12  ;;  %s570_s15 = sphi %s604_s15, %s739_s15   ;;  %s566_s14 = sphi %s602_s14, %s738_s14   ;;  %s562_s13 = sphi %s600_s13, %s737_s13   ;;  %s558_s12 = sphi %s598_s12, %s736_s12  }
   0x5   : > { %p725_p1 = scmp.eq.s32.totalorder %s617_s16, 0  ;;  %p379_p2 = scmp.ge.s32.totalorder %s570_s15, 1 }
   0x6   : > { %p116_p3 = scmp.lt.s32.totalorder %s570_s15, 3  ;;  %s572_s19 = smov [#allocation4]  }
   0x7   : > { %p625_p4 = por %p725_p1, %p37_p0  ;;  %s128_s20 = sshll.u32 %s572_s19, 4  ;;  %s129_s20 = int_to_ptr.vmem [resolvable:$true] %s128_s20 }
   0x8   : > { %p629_p5 = pnand %p379_p2, %p116_p3  ;;  %s642_s22 = sadd.s32 1, %s570_s15  }
   0x9   : > { %s728_s17 = scalar_select %p625_p4, 1, 0 }
   0xa   : > { %s729_s18 = scalar_select %p629_p5, 1, 0 }
   0xb   : > { %p426_p6 = pneg %p629_p5  ;;  %s24_s23 = sadd.s32 1, %s566_s14 }
   0xc   : > { %s21_s24 = ssub.s32 %s570_s15, %s642_s22  ;;  %s489_s25 = scalar_lea.vmem %s129_s20, 1024 }
   0xd   : > { %p637_p7 = pnand %p426_p6, %p725_p1  ;;  %p490_p9 = scmp.ne.s32.totalorder %s129_s20, %s489_s25 }
   0xe   : > { %p497_p12 = scmp.lt.s32.totalorder %s129_s20, %s129_s20  ;;  %p498_p13 = scmp.lt.s32.totalorder %s489_s25, %s489_s25 }
   0xf   : > { %p480_p8 = pneg %p637_p7 }
  0x10   : > { %p499_p0 = por %p498_p13, %p497_p12 }
  0x11   : > { %p492_p10 = pnand %p490_p9, %p480_p8 }
  0x13   : > { %p493_p11 = pneg %p492_p10 }
  0x15   : > { %p500_p2 = pnand %p499_p0, %p493_p11 }
  0x17   : > { %503 = shalt.err (!%p500_p2)
}
  0x18   : > { %s573_s26 = smov 128   ;;  %s574_s27 = smov 8  }
  0x19   : > { %429 = dma.hbm_to_vmem [thread:$0]  (!%p637_p7), %s722_s1, 1024, %s129_s20, [#allocation5], %s573_s26, %s573_s26, %s574_s27  }
  0x1a   : > { %p22_p3 = scmp.eq.s32.totalorder %s21_s24, 0  ;;  %p31_p6 = scmp.ne.s32.totalorder %s566_s14, %s562_s13 }
  0x1b   : > { %p32_p8 = scmp.eq.s32.totalorder %s570_s15, 0  ;;  %p435_p9 = scmp.lt.s32.totalorder %s570_s15, 2 }
  0x1c   : > { %s659_s30 = scalar_select %p22_p3, %s566_s14, %s24_s23  }
  0x1d   : > { %p33_p10 = por %p32_p8, %p31_p6  ;;  %s145_s4 = sand.u32 1, %s566_s14  }
  0x1e   : > { %s382_s5 = sshll.u32 %s145_s4, 3  ;;  %s383_s6 = sshll.u32 %s570_s15, 7 }
  0x1f   : > { %s666_s9 = scalar_lea.hbm %s721_s0, %s383_s6  ;;  %s149_s10 = scalar_lea.vmem [#allocation2], %s382_s5 }
  0x20   : > { %s156_s11 = sshll.u32 %s149_s10, 4  ;;  %p668_p7 = pnand %p435_p9, %p33_p10  ;;  %s157_s11 = int_to_ptr.vmem [resolvable:$true] %s156_s11 }
  0x21   : > { %s146_s19 = scalar_lea.sflag [#allocation3], %s145_s4  ;;  %s504_s20 = scalar_lea.hbm %s666_s9, 128 }
  0x22   : > { %p505_p11 = scmp.ne.s32.totalorder %s666_s9, %s504_s20  ;;  %p506_p12 = pneg %p668_p7 }
  0x23   : > { %s509_s23 = scalar_lea.hbm %s721_s0, 256  ;;  %p510_p2 = scmp.lt.s32.totalorder %s666_s9, %s721_s0 }
  0x24   : > { %p507_p13 = pnand %p506_p12, %p505_p11  ;;  %p511_p3 = scmp.lt.s32.totalorder %s509_s23, %s504_s20 }
  0x26   : > { %p508_p0 = pneg %p507_p13  ;;  %p512_p6 = por %p511_p3, %p510_p2 }
  0x28   : > { %p513_p8 = pnand %p512_p6, %p508_p0 }
  0x2a   : > { %516 = shalt.err (!%p513_p8)
}
  0x2b   : > { %s517_s26 = scalar_lea.vmem %s157_s11, 128  ;;  %s575_s27 = smov [#allocation2]  }
  0x2c   : > { %p518_p9 = scmp.ne.s32.totalorder %s157_s11, %s517_s26  ;;  %s522_s28 = sshll.u32 %s575_s27, 4  ;;  %s523_s28 = int_to_ptr.vmem [resolvable:$false] %s522_s28 }
  0x2d   : > { %s524_s29 = scalar_lea.vmem %s523_s28, 256  ;;  %p525_p11 = scmp.lt.s32.totalorder %s157_s11, %s523_s28 }
  0x2e   : > { %p520_p10 = pnand %p518_p9, %p506_p12  ;;  %p526_p13 = scmp.lt.s32.totalorder %s524_s29, %s517_s26 }
  0x30   : > { %p521_p1 = pneg %p520_p10  ;;  %p527_p4 = por %p526_p13, %p525_p11 }
  0x32   : > { %p528_p5 = pnand %p527_p4, %p521_p1 }
  0x34   : > { %531 = shalt.err (!%p528_p5)
}
  0x35   : > { %433 = dma.hbm_to_vmem [thread:$0]  (!%p668_p7), %s666_s9, 128, %s157_s11, %s146_s19  }
  0x36   : > { %p732_p0 = scmp.ne.s32.totalorder %s729_s18, 0 }
  0x37   : > { %s167_s4 = sand.u32 (!%p732_p0), 1, %s562_s13   ;;  %p733_p12 = scmp.ne.s32.totalorder (!%p732_p0), %s728_s17, 0 }
  0x38   : > { %165 = sbr.rel (%p732_p0) target bundleno = 590 (0x24e), region = 32  ;;  %s689_s5 = sshll.u32 (!%p732_p0), %s167_s4, 3 }
  0x39   : > { %s168_s6 = scalar_lea.sflag (!%p732_p0), [#allocation3], %s167_s4  ;;  %s171_s7 = scalar_lea.vmem (!%p732_p0), [#allocation2], %s689_s5 }
  0x3d   : > { %549 = dma.done.wait (%p733_p12), %s168_s6, 128  }
  0x3e   : > { %551 = vsyncadd (%p733_p12), %s168_s6, 4294967168  ;;  %p734_p1 = scmp.eq.s32.totalorder %s617_s16, 0 }
  0x40   : > { %553 = dma.done.wait (%p734_p1), [#allocation5], 1024   ;;  %p735_p4 = pmov %p734_p1 }
  0x41   : > { %v576_v0 = vmov 0.0   ;;  %vm577_vm0 = vmmov 0   ;;  %v209_v1 = vld [vmem:[#allocation4 + $0x38] sm:$0xff]  ;;  %v208_v2 = vld [vmem:[#allocation4 + $0x30] sm:$0xff]  ;;  %v207_v3 = vld [vmem:[#allocation4 + $0x28] sm:$0xff]  ;;  %vm217_vm1 = vcmask 523264  }
  0x42   : > { %555 = vsyncadd (%p735_p4), [#allocation5], 4294966272  ;;  %401 = vmatprep.subr.mxu0 %v576_v0  ;;  %417 = vmatprep.mubr.msk.f32.mxu0 %vm577_vm0, %v576_v0  ;;  %v206_v4 = vld [vmem:[#allocation4 + $0x20] sm:$0xff]  ;;  %v205_v5 = vld [vmem:[#allocation4 + $0x18] sm:$0xff]  ;;  %p197_p5 = scmp.lt.s32.totalorder %s617_s16, 1  ;;  %vm301_vm2 = vcmask 31744  }
  0x43   : > { %402 = vmatpush3.msra.mxu0 %v209_v1  ;;  %v204_v6 = vld [vmem:[#allocation4 + $0x10] sm:$0xff]  ;;  %v203_v7 = vld [vmem:[#allocation4 + $0x8] sm:$0xff]  ;;  %v202_v8 = vld [vmem:[#allocation4] sm:$0xff] }
  0x44   : > { %403 = vmatprep.subr.mxu0 %v576_v0  ;;  %v201_v9 = vld [vmem:[%s171_s7] sm:$0xff]  ;;  %s741_s16 = smov (!%p197_p5, %s617_s16), 1 }
  0x45   : > { %404 = vmatpush3.msra.mxu0 %v208_v2  ;;  %v388_v10 = vld [vmem:[%s723_s2] ss:$0 sm:$0xff]  ;;  %s387_s8 = sshll.u32 %s741_s16, 3 }
  0x46   : > { %405 = vmatprep.subr.mxu0 %v576_v0  ;;  %s200_s11 = scalar_lea.vmem %s724_s3, %s387_s8 }
  0x47   : > { %406 = vmatpush3.msra.mxu0 %v207_v3 }
  0x48   : > { %407 = vmatprep.subr.mxu0 %v576_v0 }
  0x49   : > { %408 = vmatpush3.msra.mxu0 %v206_v4 }
  0x4a   : > { %409 = vmatprep.subr.mxu0 %v576_v0 }
  0x4b   : > { %410 = vmatpush3.msra.mxu0 %v205_v5 }
  0x4c   : > { %411 = vmatprep.subr.mxu0 %v576_v0 }
  0x4d   : > { %412 = vmatpush3.msra.mxu0 %v204_v6 }
  0x4e   : > { %413 = vmatprep.subr.mxu0 %v576_v0 }
  0x4f   : > { %414 = vmatpush3.msra.mxu0 %v203_v7 }
  0x50   : > { %415 = vmatprep.subr.mxu0 %v576_v0 }
  0x51   : > { %416 = vmatpush3.msra.mxu0 %v202_v8 }
  0x52   : > { %418 = vmatmul.mubr.msk.f32.vlgmr.msra.gmra.mxu0 %vm217_vm1, %v201_v9 }
 0x112   : > { %v287_v11 = vpop.f32.mrf.mxu0 }
 0x113   : > { %v288_v12 = vadd.f32 %v388_v10, %v287_v11 }
 0x114   : > { %v419_v13 = vpop.f32.mrf.mxu0 }
 0x115   : > { %291 = vmax.xlane.f32.xlu0 %v288_v12 }
 0x19e   : > { %v292_v14 = vpop.xlane.xlu0 %291 }
 0x19f   : > { %v293_v15 = vsub.f32 %v288_v12, %v292_v14 }
 0x1a1   : > { %v294_v16 = vmul.f32 1.442695, %v293_v15 }
 0x1a3   : > { %474 = vpow2.f32 %v294_v16 }
 0x1b0   : > { %v475_v17 = vpop.eup %474 }
 0x1b1   : > { %296 = vadd.xlane.f32.xlu0 %v475_v17 }
 0x23a   : > { %v297_v18 = vpop.xlane.xlu0 %296 }
 0x23b   : > { %476 = vlog2.f32 %v297_v18 }
 0x248   : > { %v477_v19 = vpop.eup %476 }
 0x249   : > { %v299_v20 = vmul.f32 0.6931472, %v477_v19 }
 0x24b   : > { %v300_v21 = vsub.f32 %v293_v15, %v299_v20 }
 0x24d   : > { %302 = vst.msk [vmem:[%s200_s11] sm:$0xff] %vm301_vm2, %v300_v21 }
 0x24e PF: > { %p14_p7 = scmp.ge.s32.totalorder %s642_s22, 4   ;;  %s736_s12 = smov %s562_s13 }
 0x24f   : > { %s737_s13 = smov %s566_s14  ;;  %s738_s14 = smov %s659_s30 }
 0x250   : > { %s739_s15 = smov %s642_s22  ;;  %16 = sbr.rel (!%p14_p7) target bundleno = 4 (0x4), region = 76 }
 0x255   :  { %322 = vsyncpa [#allocation3], 1 }
 0x256   :  { %324 = vsyncpa [#allocation3 + $0x1], 1 }
 0x257   :  { %325 = vsyncpa [#allocation5], 1 }

</bundles_post_ra>
